<compile_context>
chip_gen: v5e
topology: v5e:2x2
jax: 0.10.0
libtpu: 0.0.40
codegen_flags: <defaults>
</compile_context>

<pallas_src>
import jax
import jax.numpy as jnp
from jax.experimental import pallas as pl
from jax.experimental.pallas import tpu as pltpu


_LANES = 2048                       # preferred lane-dense slab width (mult of 128)
_BLOCK_BYTES = 4 * 1024 * 1024      # per-array, per-block VMEM budget
_VMEM_LIMIT = 32 * 1024 * 1024      # 3 arrays x 2 buffers x 4 MiB = 24 MiB live


def _cdiv(a, b):
    return -(-a // b)


def _round_up(a, b):
    return _cdiv(a, b) * b


def _sublane_multiple(dtype):
    itemsize = jnp.dtype(dtype).itemsize
    return max(8, 32 // itemsize)   # 8 (f32) / 16 (bf16) / 32 (int8, fp8)


def _pick_view(shape, total):
    """Return (rows, lanes, needs_pad): lossless 2-D lane-dense view if possible."""
    if total % _LANES == 0:
        return total // _LANES, _LANES, False
    last = shape[-1] if len(shape) >= 1 else 1
    if len(shape) >= 2 and last % 128 == 0 and last <= 32768:
        return total // last, last, False
    if total % 128 == 0:
        return total // 128, 128, False
    # Ragged total: pad the flat tail up to a multiple of _LANES (rare path).
    return _cdiv(total, _LANES), _LANES, True


def _pick_block_rows(rows, lanes, itemsize, sub):
    budget_rows = max(sub, (_BLOCK_BYTES // (lanes * itemsize)) // sub * sub)
    if rows < 2 * sub:
        return rows                 # single block == full extent (always legal)
    # >= 2 grid blocks so the "parallel" axis shards across both v7x TCs.
    n_blocks = max(_cdiv(rows, budget_rows), 2)
    block_rows = _round_up(_cdiv(rows, n_blocks), sub)
    return min(block_rows, budget_rows)


def _interp_add_mul_kernel(alpha_ref, p_ref, q_ref, o_ref):
    alpha = alpha_ref[0]            # uniform scalar, prefetched into SMEM

    # ---- alpha == 0: soft_exp is identity -> out = p + q -------------------
    @pl.when(alpha == 0.0)
    def _():
        o_ref[...] = (p_ref[...] + q_ref[...]).astype(o_ref.dtype)

    # ---- alpha > 0: inner logs and outer exp cancel -> pure VPU math -------
    @pl.when(alpha > 0.0)
    def _():
        a = alpha
        inv_a = 1.0 / a             # scalar reciprocal hoisted out of vector math
        p = p_ref[...].astype(jnp.float32)
        q = q_ref[...].astype(jnp.float32)
        u = 1.0 + a * (p - a)       # = exp(a * soft_exp(-a, p))
        v = 1.0 + a * (q - a)       # = exp(a * soft_exp(-a, q))
        out = (u * v - 1.0) * inv_a + a
        # Preserve the reference's NaN domain (log of a negative argument).
        out = jnp.where(jnp.minimum(u, v) < 0.0, jnp.nan, out)
        o_ref[...] = out.astype(o_ref.dtype)

    # ---- alpha < 0: 2 exp + 1 log per element ------------------------------
    @pl.when(alpha < 0.0)
    def _():
        na = -alpha                 # na > 0
        inv_na = 1.0 / na
        p = p_ref[...].astype(jnp.float32)
        q = q_ref[...].astype(jnp.float32)
        arg = jnp.exp(na * p) + jnp.exp(na * q) - 1.0 + na * na
        o_ref[...] = (jnp.log(arg) * inv_na).astype(o_ref.dtype)


def interpolate_add_multiply(p, q, alpha):
    """Pallas-backed forward of InterpolateAddMultiply for arbitrary-shape p, q."""
    assert p.shape == q.shape and p.dtype == q.dtype
    orig_shape = p.shape
    dtype = p.dtype
    total = int(p.size)
    if total == 0:
        return p + q

    itemsize = jnp.dtype(dtype).itemsize
    sub = _sublane_multiple(dtype)
    rows, lanes, needs_pad = _pick_view(orig_shape, total)

    if needs_pad:
        # Rare ragged path: one small pad + final slice (cannot be avoided
        # without a copy when total is not a multiple of 128).
        padded_total = rows * lanes
        p2 = jnp.pad(p.reshape(-1), (0, padded_total - total)).reshape(rows, lanes)
        q2 = jnp.pad(q.reshape(-1), (0, padded_total - total)).reshape(rows, lanes)
    else:
        # Free (metadata-only) reshape: no HBM copies before or after the kernel.
        p2 = p.reshape(rows, lanes)
        q2 = q.reshape(rows, lanes)

    block_rows = _pick_block_rows(rows, lanes, itemsize, sub)
    n_blocks = _cdiv(rows, block_rows)   # last block may be partial
    alpha_arr = jnp.asarray(alpha, jnp.float32).reshape((1,))

    cost = pl.CostEstimate(
        flops=12 * total,
        transcendentals=3 * total,
        bytes_accessed=3 * total * itemsize,
    )

    out2 = pl.pallas_call(
        _interp_add_mul_kernel,
        out_shape=jax.ShapeDtypeStruct((rows, lanes), dtype),
        grid_spec=pltpu.PrefetchScalarGridSpec(
            num_scalar_prefetch=1,
            grid=(n_blocks,),
            in_specs=[
                pl.BlockSpec((block_rows, lanes), lambda i, a_ref: (i, 0)),
                pl.BlockSpec((block_rows, lanes), lambda i, a_ref: (i, 0)),
            ],
            out_specs=pl.BlockSpec((block_rows, lanes), lambda i, a_ref: (i, 0)),
        ),
        compiler_params=pltpu.CompilerParams(
            dimension_semantics=("parallel",),
            vmem_limit_bytes=_VMEM_LIMIT,
        ),
        cost_estimate=cost,
    )(alpha_arr, p2, q2)

    if needs_pad:
        return out2.reshape(-1)[:total].reshape(orig_shape)
    return out2.reshape(orig_shape)


# ----------------------------- pure-JAX reference -----------------------------
def _soft_exp_ref(alpha, x):
    if alpha == 0.0:
        return x
    if alpha < 0.0:
        return -jnp.log(1.0 - alpha * (x + alpha)) / alpha
    return (jnp.exp(alpha * x) - 1.0) / alpha + alpha


def _forward_ref(p, q, alpha):
    return _soft_exp_ref(alpha, _soft_exp_ref(-alpha, p) + _soft_exp_ref(-alpha, q))


if __name__ == "__main__":
    key = jax.random.PRNGKey(0)
    kp, kq = jax.random.split(key)

    # Small shapes consistent with the module (element-wise over hidden states):
    #  (8, 32)  -> copy-free 128-lane path,
    #  (16,128) -> copy-free 2048-lane path,
    #  (7, 33)  -> ragged pad fallback.
    shapes = [(8, 32), (16, 128), (7, 33)]
    # alpha = 0.0 is the module's default init; also hit the >0 and <0 branches.
    alphas = (0.0, 0.25, -0.1)

    ok = True
    for shape in shapes:
        p = jax.random.uniform(kp, shape, dtype=jnp.float32, minval=-2.0, maxval=2.0)
        q = jax.random.uniform(kq, shape, dtype=jnp.float32, minval=-2.0, maxval=2.0)
        for alpha in alphas:
            out = jax.block_until_ready(interpolate_add_multiply(p, q, alpha))
            ref = _forward_ref(p, q, alpha)
            if not jnp.allclose(out, ref, atol=1e-4, rtol=1e-4):
                ok = False

    print("KERNEL_OK" if ok else "KERNEL_MISMATCH")
</pallas_src>

<mosaic_0001>
module attributes {stable_mosaic.version = 11 : i64} {
  func.func @_interp_add_mul_kernel(%arg0: i32, %arg1: memref<1xf32, #tpu.memory_space<smem>>, %arg2: memref<2x128xf32, #tpu.memory_space<vmem>>, %arg3: memref<2x128xf32, #tpu.memory_space<vmem>>, %arg4: memref<2x128xf32, #tpu.memory_space<vmem>>) attributes {dimension_semantics = [#tpu.dimension_semantics<parallel>], iteration_bounds = array<i64: 1>, scalar_prefetch = 1 : i64, scratch_operands = 0 : i64, tpu.core_type = #tpu.core_type<tc>, window_params = [{transform_indices = @transform_0, window_bounds = array<i64: 2, 128>}, {transform_indices = @transform_1, window_bounds = array<i64: 2, 128>}, {transform_indices = @transform_2, window_bounds = array<i64: 2, 128>}]} {
    %c0 = arith.constant 0 : index
    %0 = memref.load %arg1[%c0] : memref<1xf32, #tpu.memory_space<smem>>
    %cst = arith.constant 0.000000e+00 : f32
    %1 = arith.cmpf oeq, %0, %cst : f32
    %2 = arith.extui %1 : i1 to i32
    %c0_i32 = arith.constant 0 : i32
    %3 = arith.cmpi ne, %2, %c0_i32 : i32
    scf.if %3 {
      %c0_4 = arith.constant 0 : index
      %c0_5 = arith.constant 0 : index
      %10 = vector.load %arg2[%c0_4, %c0_5] : memref<2x128xf32, #tpu.memory_space<vmem>>, vector<2x128xf32>
      %c0_6 = arith.constant 0 : index
      %c0_7 = arith.constant 0 : index
      %11 = vector.load %arg3[%c0_6, %c0_7] : memref<2x128xf32, #tpu.memory_space<vmem>>, vector<2x128xf32>
      %12 = arith.addf %10, %11 : vector<2x128xf32>
      %c0_8 = arith.constant 0 : index
      %c0_9 = arith.constant 0 : index
      %13 = vector.load %arg4[%c0_8, %c0_9] : memref<2x128xf32, #tpu.memory_space<vmem>>, vector<2x128xf32>
      tpu.vector_store %arg4[%c0_8, %c0_9], %12 {strides = array<i32>} : memref<2x128xf32, #tpu.memory_space<vmem>>, vector<2x128xf32>,
    } else {
    }
    %cst_0 = arith.constant 0.000000e+00 : f32
    %4 = arith.cmpf ogt, %0, %cst_0 : f32
    %5 = arith.extui %4 : i1 to i32
    %c0_i32_1 = arith.constant 0 : i32
    %6 = arith.cmpi ne, %5, %c0_i32_1 : i32
    scf.if %6 {
      %cst_4 = arith.constant 1.000000e+00 : f32
      %10 = arith.divf %cst_4, %0 : f32
      %c0_5 = arith.constant 0 : index
      %c0_6 = arith.constant 0 : index
      %11 = vector.load %arg2[%c0_5, %c0_6] : memref<2x128xf32, #tpu.memory_space<vmem>>, vector<2x128xf32>
      %c0_7 = arith.constant 0 : index
      %c0_8 = arith.constant 0 : index
      %12 = vector.load %arg3[%c0_7, %c0_8] : memref<2x128xf32, #tpu.memory_space<vmem>>, vector<2x128xf32>
      %13 = vector.broadcast %0 : f32 to vector<2x128xf32>
      %14 = arith.subf %11, %13 : vector<2x128xf32>
      %15 = vector.broadcast %0 : f32 to vector<2x128xf32>
      %16 = arith.mulf %15, %14 : vector<2x128xf32>
      %cst_9 = arith.constant 1.000000e+00 : f32
      %17 = vector.broadcast %cst_9 : f32 to vector<2x128xf32>
      %18 = arith.addf %17, %16 : vector<2x128xf32>
      %19 = vector.broadcast %0 : f32 to vector<2x128xf32>
      %20 = arith.subf %12, %19 : vector<2x128xf32>
      %21 = vector.broadcast %0 : f32 to vector<2x128xf32>
      %22 = arith.mulf %21, %20 : vector<2x128xf32>
      %cst_10 = arith.constant 1.000000e+00 : f32
      %23 = vector.broadcast %cst_10 : f32 to vector<2x128xf32>
      %24 = arith.addf %23, %22 : vector<2x128xf32>
      %25 = arith.mulf %18, %24 : vector<2x128xf32>
      %cst_11 = arith.constant 1.000000e+00 : f32
      %26 = vector.broadcast %cst_11 : f32 to vector<2x128xf32>
      %27 = arith.subf %25, %26 : vector<2x128xf32>
      %28 = vector.broadcast %10 : f32 to vector<2x128xf32>
      %29 = arith.mulf %27, %28 : vector<2x128xf32>
      %30 = vector.broadcast %0 : f32 to vector<2x128xf32>
      %31 = arith.addf %29, %30 : vector<2x128xf32>
      %32 = arith.minimumf %18, %24 : vector<2x128xf32>
      %cst_12 = arith.constant 0.000000e+00 : f32
      %33 = vector.broadcast %cst_12 : f32 to vector<2x128xf32>
      %34 = arith.cmpf olt, %32, %33 : vector<2x128xf32>
      %cst_13 = arith.constant 0x7FC00000 : f32
      %35 = vector.broadcast %cst_13 : f32 to vector<2x128xf32>
      %36 = arith.select %34, %35, %31 : vector<2x128xi1>, vector<2x128xf32>
      %c0_14 = arith.constant 0 : index
      %c0_15 = arith.constant 0 : index
      %37 = vector.load %arg4[%c0_14, %c0_15] : memref<2x128xf32, #tpu.memory_space<vmem>>, vector<2x128xf32>
      tpu.vector_store %arg4[%c0_14, %c0_15], %36 {strides = array<i32>} : memref<2x128xf32, #tpu.memory_space<vmem>>, vector<2x128xf32>,
    } else {
    }
    %cst_2 = arith.constant 0.000000e+00 : f32
    %7 = arith.cmpf olt, %0, %cst_2 : f32
    %8 = arith.extui %7 : i1 to i32
    %c0_i32_3 = arith.constant 0 : i32
    %9 = arith.cmpi ne, %8, %c0_i32_3 : i32
    scf.if %9 {
      %cst_4 = arith.constant 0.000000e+00 : f32
      %10 = arith.subf %cst_4, %0 : f32
      %cst_5 = arith.constant 1.000000e+00 : f32
      %11 = arith.divf %cst_5, %10 : f32
      %c0_6 = arith.constant 0 : index
      %c0_7 = arith.constant 0 : index
      %12 = vector.load %arg2[%c0_6, %c0_7] : memref<2x128xf32, #tpu.memory_space<vmem>>, vector<2x128xf32>
      %c0_8 = arith.constant 0 : index
      %c0_9 = arith.constant 0 : index
      %13 = vector.load %arg3[%c0_8, %c0_9] : memref<2x128xf32, #tpu.memory_space<vmem>>, vector<2x128xf32>
      %14 = vector.broadcast %10 : f32 to vector<2x128xf32>
      %15 = arith.mulf %14, %12 : vector<2x128xf32>
      %16 = math.exp %15 : vector<2x128xf32>
      %17 = vector.broadcast %10 : f32 to vector<2x128xf32>
      %18 = arith.mulf %17, %13 : vector<2x128xf32>
      %19 = math.exp %18 : vector<2x128xf32>
      %20 = arith.addf %16, %19 : vector<2x128xf32>
      %cst_10 = arith.constant 1.000000e+00 : f32
      %21 = vector.broadcast %cst_10 : f32 to vector<2x128xf32>
      %22 = arith.subf %20, %21 : vector<2x128xf32>
      %23 = arith.mulf %10, %10 : f32
      %24 = vector.broadcast %23 : f32 to vector<2x128xf32>
      %25 = arith.addf %22, %24 : vector<2x128xf32>
      %26 = math.log %25 : vector<2x128xf32>
      %27 = vector.broadcast %11 : f32 to vector<2x128xf32>
      %28 = arith.mulf %26, %27 : vector<2x128xf32>
      %c0_11 = arith.constant 0 : index
      %c0_12 = arith.constant 0 : index
      %29 = vector.load %arg4[%c0_11, %c0_12] : memref<2x128xf32, #tpu.memory_space<vmem>>, vector<2x128xf32>
      tpu.vector_store %arg4[%c0_11, %c0_12], %28 {strides = array<i32>} : memref<2x128xf32, #tpu.memory_space<vmem>>, vector<2x128xf32>,
    } else {
    }
    return
  }
  func.func @transform_0(%arg0: i32, %arg1: memref<1xf32, #tpu.memory_space<smem>>) -> (i32, i32) {
    %c0_i32 = arith.constant 0 : i32
    %c0_i32_0 = arith.constant 0 : i32
    return %arg0, %c0_i32 : i32, i32
  }
  func.func @transform_1(%arg0: i32, %arg1: memref<1xf32, #tpu.memory_space<smem>>) -> (i32, i32) {
    %c0_i32 = arith.constant 0 : i32
    %c0_i32_0 = arith.constant 0 : i32
    return %arg0, %c0_i32 : i32, i32
  }
  func.func @transform_2(%arg0: i32, %arg1: memref<1xf32, #tpu.memory_space<smem>>) -> (i32, i32) {
    %c0_i32 = arith.constant 0 : i32
    %c0_i32_0 = arith.constant 0 : i32
    return %arg0, %c0_i32 : i32, i32
  }
}

</mosaic_0001>

<bundles_post_ra>
// kernel: tpu_custom_call.1
= control target key start
LH: loop header
LB: loop body
LE: loop exit
PB: predicated region body
PF: predicated region fallthrough
CT: control target
= control target key end

     0   :  { %9 = vsyncpa [#allocation5], 0  ;;  %s259_s0 = inlined_call_operand.<no memory space> [shape: f32[1], index: 0, kind: input, shape index: {}]   ;;  %s260_s1 = inlined_call_operand.vmem [shape: f32[2,128], index: 1, kind: input, shape index: {}]   ;;  %s261_s2 = inlined_call_operand.hbm [shape: f32[2,128], index: 2, kind: input, shape index: {}]   ;;  %s262_s3 = inlined_call_operand.hbm [shape: f32[2,128], index: 3, kind: output, shape index: {}]  }
   0x1   :  { %10 = vsyncpa [#allocation6], 0  ;;  %s18_s14 = sshll.u32 %s261_s2, 4  ;;  %s202_s15 = smov [#allocation4]   ;;  %s19_s14 = int_to_ptr.hbm [resolvable:$true] %s18_s14 }
   0x2   :  { %s20_s16 = sshll.u32 %s202_s15, 4  ;;  %s21_s16 = int_to_ptr.vmem [resolvable:$true] %s20_s16 }
   0x3   :  { %23 = dma.hbm_to_vmem [thread:$0]  %s19_s14, 32, %s21_s16, [#allocation5]  }
   0x4   :  { %198 = dma.done.wait [#allocation5], 32  }
   0x5   :  { %199 = vsyncadd [#allocation5], 4294967264  ;;  %p29_p0 = scmp.eq.f32.partialorder %s259_s0, 0.0 }
   0x6   :  { %v33_v0 = vld [vmem:[%s260_s1] sm:$0x3] (%p29_p0) }
   0x7   :  { %32 = sbr.rel (!%p29_p0) target bundleno = 12 (0xc), region = 17  ;;  %v34_v1 = vld [vmem:[#allocation4] sm:$0x3] (%p29_p0) }
   0x8   :  { %v35_v2 = vadd.f32 (%p29_p0), %v34_v1, %v33_v0 }
   0xa   :  { %36 = vst [vmem:[#allocation7] sm:$0x3] (%p29_p0), %v35_v2 }
   0xc PF:  { %p37_p1 = scmp.gt.f32.partialorder %s259_s0, 0.0 }
   0xd   :  { %v41_v3 = vstv (%p37_p1), %s259_s0  ;;  %v57_v14 = vld [vmem:[%s260_s1] sm:$0x3] (%p37_p1) }
   0xe   :  { %40 = sbr.rel (!%p37_p1) target bundleno = 88 (0x58), region = 21  ;;  %140 = vrcp.f32 (%p37_p1), %v41_v3  ;;  %v53_v6 = vand.u32 (%p37_p1), 2147483648, %v41_v3  ;;  %vm47_vm0 = vweird.f32 (%p37_p1), %v41_v3  ;;  %v51_v8 = vand.u32 (%p37_p1), 2147483647, %v41_v3  ;;  %v58_v15 = vld [vmem:[#allocation4] sm:$0x3] (%p37_p1) }
   0xf   :  { %v60_v16 = vsub.f32 (%p37_p1), %v57_v14, %v41_v3  ;;  %v63_v17 = vsub.f32 (%p37_p1), %v58_v15, %v41_v3 }
  0x10   :  { %v54_v10 = vor.u32 (%p37_p1), 1.1754944e-38, %v53_v6  ;;  %vm52_vm3 = vcmp.eq.f32.partialorder (%p37_p1), %v51_v8, 8.507059e+37 }
  0x11   :  { %v61_v18 = vmul.f32 (%p37_p1), %v60_v16, %v41_v3  ;;  %v64_v19 = vmul.f32 (%p37_p1), %v63_v17, %v41_v3 }
  0x13   :  { %v62_v20 = vadd.f32 1.0, %v61_v18  ;;  %v65_v21 = vadd.f32 1.0, %v64_v19 }
  0x14   :  { %v141_v4 = vpop.eup %140 }
  0x15   :  { %v43_v5 = vmul.f32 %v141_v4, %v41_v3  ;;  %vm48_vm1 = vweird.f32 %v141_v4  ;;  %v66_v22 = vmul.f32 %v65_v21, %v62_v20  ;;  %v71_v24 = vmin.f32 %v62_v20, %v65_v21 }
  0x16   :  { %vm49_vm2 = vmor %vm47_vm0, %vm48_vm1 }
  0x17   :  { %v44_v7 = vsub.f32 1.0, %v43_v5  ;;  %v132_v23 = vadd.f32 -1.0, %v66_v22  ;;  %vm72_vm4 = vcmp.lt.f32.partialorder %v71_v24, 0.0 }
  0x19   :  { %v45_v9 = vmul.f32 %v141_v4, %v44_v7 }
  0x1b   :  { %v46_v11 = vadd.f32 %v141_v4, %v45_v9 }
  0x1d   :  { %v50_v12 = vsel %vm49_vm2, %v141_v4, %v46_v11 }
  0x1e   :  { %v55_v13 = vsel %vm52_vm3, %v54_v10, %v50_v12 }
  0x1f   :  { %134 = vpush %v55_v13 }
  0x50   :  { %s135_s26 = spop %134 }
  0x51   :  { %v68_v25 = vstv %s135_s26 }
  0x52   :  { %v69_v26 = vmul.f32 %v132_v23, %v68_v25 }
  0x54   :  { %v70_v27 = vadd.f32 %v69_v26, %v41_v3 }
  0x56   :  { %v73_v28 = vsel %vm72_vm4, nan, %v70_v27 }
  0x57   :  { %74 = vst [vmem:[#allocation7] sm:$0x3] %v73_v28 }
  0x58 PF:  { %p75_p2 = scmp.lt.f32.partialorder %s259_s0, 0.0 }
  0x59   :  { %s248_s4 = ssub.f32 (%p75_p2), 0.0, %s259_s0  ;;  %v96_v40 = vld [vmem:[%s260_s1] sm:$0x3] (%p75_p2) }
  0x5a   :  { %78 = sbr.rel (!%p75_p2) target bundleno = 163 (0xa3), region = 25  ;;  %v97_v41 = vld [vmem:[#allocation4] sm:$0x3] (%p75_p2) }
  0x5b   :  { %v80_v29 = vstv (%p75_p2), %s248_s4  ;;  %s107_s6 = smul.f32 (%p75_p2), %s248_s4, %s248_s4 }
  0x5c   :  { %142 = vrcp.f32 (%p75_p2), %v80_v29  ;;  %v92_v32 = vand.u32 (%p75_p2), 2147483648, %v80_v29  ;;  %vm86_vm5 = vweird.f32 (%p75_p2), %v80_v29  ;;  %v90_v34 = vand.u32 (%p75_p2), 2147483647, %v80_v29 }
  0x5d   :  { %v99_v42 = vmul.f32 (%p75_p2), %v96_v40, %v80_v29  ;;  %v102_v43 = vmul.f32 (%p75_p2), %v97_v41, %v80_v29  ;;  %v108_v50 = vstv (%p75_p2), %s107_s6 }
  0x5e   :  { %v93_v36 = vor.u32 (%p75_p2), 1.1754944e-38, %v92_v32  ;;  %vm91_vm8 = vcmp.eq.f32.partialorder (%p75_p2), %v90_v34, 8.507059e+37 }
  0x5f   :  { %v100_v44 = vmul.f32 1.442695, %v99_v42  ;;  %v103_v45 = vmul.f32 1.442695, %v102_v43 }
  0x61   :  { %144 = vpow2.f32 %v100_v44 }
  0x62   :  { %v143_v30 = vpop.eup %142  ;;  %146 = vpow2.f32 %v103_v45 }
  0x63   :  { %v82_v31 = vmul.f32 %v143_v30, %v80_v29  ;;  %vm87_vm6 = vweird.f32 %v143_v30 }
  0x64   :  { %vm88_vm7 = vmor %vm86_vm5, %vm87_vm6 }
  0x65   :  { %v83_v33 = vsub.f32 1.0, %v82_v31 }
  0x67   :  { %v84_v35 = vmul.f32 %v143_v30, %v83_v33  ;;  %v145_v46 = vpop.eup %144 }
  0x68   :  { %v147_v47 = vpop.eup %146 }
  0x69   :  { %v85_v37 = vadd.f32 %v143_v30, %v84_v35  ;;  %v105_v48 = vadd.f32 %v147_v47, %v145_v46 }
  0x6b   :  { %v89_v38 = vsel %vm88_vm7, %v143_v30, %v85_v37  ;;  %v133_v49 = vadd.f32 -1.0, %v105_v48 }
  0x6c   :  { %v94_v39 = vsel %vm91_vm8, %v93_v36, %v89_v38 }
  0x6d   :  { %136 = vpush %v94_v39  ;;  %v109_v51 = vadd.f32 %v133_v49, %v108_v50 }
  0x6f   :  { %148 = vlog2.f32 %v109_v51 }
  0x75   :  { %v149_v52 = vpop.eup %148 }
  0x76   :  { %v111_v53 = vmul.f32 0.6931472, %v149_v52 }
  0x9e   :  { %s137_s7 = spop %136 }
  0x9f   :  { %v112_v54 = vstv %s137_s7 }
  0xa0   :  { %v113_v55 = vmul.f32 %v112_v54, %v111_v53 }
  0xa2   :  { %114 = vst [vmem:[#allocation7] sm:$0x3] %v113_v55 }
  0xa3 PF:  { %s122_s9 = sshll.u32 %s262_s3, 4  ;;  %s203_s10 = smov [#allocation7]   ;;  %s123_s9 = int_to_ptr.hbm [resolvable:$true] %s122_s9 }
  0xa4   :  { %s120_s11 = sshll.u32 %s203_s10, 4  ;;  %s121_s11 = int_to_ptr.vmem [resolvable:$true] %s120_s11 }
  0xa5   :  { %125 = dma.vmem_to_hbm [thread:$0]  %s121_s11, 32, %s123_s9, [#allocation6]  }
  0xa6   :  { %200 = dma.done.wait [#allocation6], 32  }
  0xa7   :  { %201 = vsyncadd [#allocation6], 4294967264 }
  0xa8   :  { %130 = vsyncpa [#allocation5], 1 }
  0xa9   :  { %131 = vsyncpa [#allocation6], 1 }

</bundles_post_ra>
